<compile_context>
chip_gen: v7x
topology: tpu7x:2x2x1
jax: 0.10.0
libtpu: 0.0.40
codegen_flags: <defaults>
</compile_context>

<pallas_src>
import functools

import jax
import jax.numpy as jnp
import numpy as np
from jax.experimental import pallas as pl
from jax.experimental.pallas import tpu as pltpu


def _round_up(x, m):
    return ((x + m - 1) // m) * m


def _cnn_text_kernel(x_ref, wc_ref, bc_ref, wl_ref, bl_ref, out_ref,
                     *, K, P, pool_out, TB):
    # x_ref  : (1, H*TB, D_pad)  bf16, rows ordered (h, b_local); h = padded-input row
    # wc_ref : (K, D_pad, F_pad) bf16, wc[k, d, f] == W_conv[f, 0, k, d]
    # bc_ref : (1, F_pad)        f32 conv bias
    # wl_ref : (pool_out, F_pad, C_pad) bf16, wl[j, f, c] == W_lin[c, f*pool_out + j]
    # bl_ref : (1, C_pad)        f32 linear bias
    # out_ref: (TB, C_pad)       f32 (lane-dense store)
    R = pool_out * P * TB                      # conv rows consumed by the floor-pool

    # Conv2d(1->F, full-width kernel) == in-kernel im2col: K accumulated MXU matmuls
    # over shifted row slabs of the same block.  All slab offsets are multiples of
    # TB (a multiple of 16), so every slice is an aligned sublane slab.
    conv = jnp.dot(x_ref[0, 0:R, :], wc_ref[0], preferred_element_type=jnp.float32)
    for k in range(1, K):
        conv = conv + jnp.dot(x_ref[0, k * TB:k * TB + R, :], wc_ref[k],
                              preferred_element_type=jnp.float32)
    conv = jnp.maximum(conv + bc_ref[...], 0.0)          # (R, F_pad) f32, ReLU

    # max_pool2d((P, 1)) fused with the Linear: for each pooled row j take the
    # elementwise max of P aligned (TB, F_pad) slabs and accumulate its matmul
    # against that j's (F_pad, C_pad) weight slab (no lane-concatenate).
    acc = None
    for j in range(pool_out):
        g = conv[j * P * TB:(j * P + 1) * TB]
        for p in range(1, P):
            g = jnp.maximum(g, conv[(j * P + p) * TB:(j * P + p + 1) * TB])
        part = jnp.dot(g.astype(wl_ref.dtype), wl_ref[j],
                       preferred_element_type=jnp.float32)
        acc = part if acc is None else acc + part
    out_ref[...] = (acc + bl_ref[...]).astype(out_ref.dtype)


def cnn_text_classifier_forward(x, conv_w, conv_b, lin_w, lin_b,
                                *, kernel_length, pooling_height):
    """x: (B, 1, max_length, emb_dim) — identical to the PyTorch module input."""
    B, c_in, L, D = x.shape
    assert c_in == 1
    F = conv_w.shape[0]
    C = lin_w.shape[0]
    K = kernel_length
    P = pooling_height
    assert (L - K + 1) % P == 0, "module Linear sizing requires (L-K+1) % P == 0"
    pool_out = (L - K + 1) // P
    # With padding=(1,0) the conv output has L-K+3 rows; PyTorch's floor-pool matches
    # the module's Linear sizing only when floor((L-K+3)/P) == pool_out (i.e. P > 2).
    assert (L - K + 3) // P == pool_out, \
        "pooling_height <= 2 changes PyTorch's pooled size; module would not run"
    h_used = pool_out * P              # conv rows consumed by the floor-pool
    H = h_used + K - 1                 # padded-input rows the kernel needs (== L)

    LANE = 128
    D_pad = _round_up(D, LANE)
    F_pad = _round_up(F, LANE)
    C_pad = _round_up(C, LANE)
    f32 = jnp.float32

    # ---- batch-tile sizing: largest TB (multiple of 16, <= 512) whose per-step VMEM
    #      footprint fits a conservative budget, then split into >= 2 tiles when the
    #      batch allows so v7x's two TensorCores both get work.
    def vmem_bytes(tb):
        x_blk = 2 * H * tb * D_pad * 2                       # bf16 input, double-buffered
        out_blk = 2 * tb * C_pad * 4                         # f32 output, double-buffered
        weights = 2 * ((K * D_pad * F_pad + pool_out * F_pad * C_pad) * 2
                       + (F_pad + C_pad) * 4)                # wc/wl/bc/bl (double-buffered)
        conv_f32 = h_used * tb * F_pad * 4                   # f32 conv intermediate
        work = tb * F_pad * 4 + 2 * tb * C_pad * 4           # pooled slab + linear acc
        return x_blk + out_blk + weights + conv_f32 + work

    VMEM_BUDGET = 20 * 1024 * 1024     # conservative across v5e/v6e/v7x scoped limits
    TB_CAP = 512
    B16 = _round_up(B, 16)
    tb = min(TB_CAP, B16)
    while tb > 16 and vmem_bytes(tb) > VMEM_BUDGET:
        tb -= 16
    num_tiles = pl.cdiv(B16, tb)
    if num_tiles == 1 and B16 >= 32:
        num_tiles = 2                  # keep both v7x TensorCores busy; ~free on 1-TC chips
    TB = _round_up(pl.cdiv(B16, num_tiles), 16)   # balance tiles; TB <= tb so still in budget
    B_pad = num_tiles * TB
    vmem_limit = int(min(max(2 * vmem_bytes(TB), 32 * 1024 * 1024), 48 * 1024 * 1024))

    # ---- glue (pure layout work, ~1 read + 1 write of the input): reorder to
    #      (tile, h, b_local, d) rows, prepend the conv top-pad zero row, zero-pad
    #      batch/emb, cast to bf16.  The bottom conv-pad row and x's last row are
    #      never consumed by the floor-pool, so they are simply dropped.
    xb = x[:, 0, :H - 1, :].astype(jnp.bfloat16)                       # (B, H-1, D)
    xb = jnp.pad(xb, ((0, B_pad - B), (1, 0), (0, D_pad - D)))          # (B_pad, H, D_pad)
    xb = xb.reshape(num_tiles, TB, H, D_pad)
    xb = jnp.transpose(xb, (0, 2, 1, 3))                                # (tiles, H, TB, D_pad)
    xb = xb.reshape(num_tiles, H * TB, D_pad)                           # rows ordered (h, b)

    # conv weights: wc[k, d, f] = W_conv[f, 0, k, d]
    wc = jnp.transpose(conv_w[:, 0], (1, 2, 0))                         # (K, D, F)
    wc = jnp.pad(wc, ((0, 0), (0, D_pad - D), (0, F_pad - F))).astype(jnp.bfloat16)
    bc = jnp.pad(conv_b.reshape(1, F), ((0, 0), (0, F_pad - F))).astype(f32)
    # linear weights: wl[j, f, c] = W_lin[c, f*pool_out + j]  (torch flatten order)
    wl = jnp.transpose(lin_w.reshape(C, F, pool_out), (2, 1, 0))        # (pool_out, F, C)
    wl = jnp.pad(wl, ((0, 0), (0, F_pad - F), (0, C_pad - C))).astype(jnp.bfloat16)
    bl = jnp.pad(lin_b.reshape(1, C), ((0, 0), (0, C_pad - C))).astype(f32)

    kernel = functools.partial(_cnn_text_kernel, K=K, P=P, pool_out=pool_out, TB=TB)
    out = pl.pallas_call(
        kernel,
        out_shape=jax.ShapeDtypeStruct((B_pad, C_pad), f32),
        grid=(num_tiles,),
        in_specs=[
            pl.BlockSpec((1, H * TB, D_pad), lambda i: (i, 0, 0)),
            pl.BlockSpec((K, D_pad, F_pad), lambda i: (0, 0, 0)),
            pl.BlockSpec((1, F_pad), lambda i: (0, 0)),
            pl.BlockSpec((pool_out, F_pad, C_pad), lambda i: (0, 0, 0)),
            pl.BlockSpec((1, C_pad), lambda i: (0, 0)),
        ],
        out_specs=pl.BlockSpec((TB, C_pad), lambda i: (i, 0)),
        compiler_params=pltpu.CompilerParams(
            dimension_semantics=("parallel",),
            vmem_limit_bytes=vmem_limit),
    )(xb, wc, bc, wl, bl)
    return out[:B, :C]                                                  # (B, C)


def reference_forward(x, conv_w, conv_b, lin_w, lin_b, *, kernel_length, pooling_height):
    """Pure-JAX f32 reference with exact PyTorch semantics (for verification)."""
    B, _, L, D = x.shape
    F = conv_w.shape[0]
    K = kernel_length
    P = pooling_height
    pool_out = (L - K + 1) // P
    xp = jnp.pad(x[:, 0, :, :], ((0, 0), (1, 1), (0, 0)))               # (B, L+2, D)
    H_out = L + 2 - K + 1
    patches = jnp.stack([xp[:, k:k + H_out, :] for k in range(K)], axis=2)  # (B,H_out,K,D)
    conv = jnp.einsum('bhkd,fkd->bhf', patches, conv_w[:, 0]) + conv_b
    conv = jnp.maximum(conv, 0.0)
    pooled = conv[:, :pool_out * P, :].reshape(B, pool_out, P, F).max(axis=2)   # (B,pool_out,F)
    flat = jnp.transpose(pooled, (0, 2, 1)).reshape(B, F * pool_out)    # torch flatten order
    return flat @ lin_w.T + lin_b


if __name__ == "__main__":
    # Small shapes consistent with the module's constructor constraints:
    # (max_length - kernal_length + 1) must be divisible by pooling_height, P > 2.
    B = 2            # batch
    D = 32           # word_embedding_dim
    C = 4            # classes_num
    F = 8            # feature_maps
    K = 3            # kernal_length
    P = 3            # pooling_height
    L = 11           # max_length  ->  pooling_out = (11 - 3 + 1) / 3 = 3
    pool_out = (L - K + 1) // P

    key = jax.random.PRNGKey(0)
    kx, kw1, kb1, kw2, kb2 = jax.random.split(key, 5)
    x = jax.random.normal(kx, (B, 1, L, D), dtype=jnp.float32)
    conv_w = 0.1 * jax.random.normal(kw1, (F, 1, K, D), dtype=jnp.float32)
    conv_b = 0.1 * jax.random.normal(kb1, (F,), dtype=jnp.float32)
    lin_w = 0.1 * jax.random.normal(kw2, (C, F * pool_out), dtype=jnp.float32)
    lin_b = 0.1 * jax.random.normal(kb2, (C,), dtype=jnp.float32)

    out = cnn_text_classifier_forward(x, conv_w, conv_b, lin_w, lin_b,
                                      kernel_length=K, pooling_height=P)
    out = jax.block_until_ready(out)
    ref = reference_forward(x, conv_w, conv_b, lin_w, lin_b,
                            kernel_length=K, pooling_height=P)
    # bf16 MXU inputs (f32 accumulation) -> slightly looser tolerance than pure f32.
    np.testing.assert_allclose(np.asarray(out), np.asarray(ref), rtol=3e-2, atol=3e-2)

    # Second check: a batch large enough to exercise batch padding and the
    # >= 2-tile (megacore) path of the tile-sizing logic.
    B2 = 24
    x_big = jax.random.normal(jax.random.PRNGKey(1), (B2, 1, L, D), dtype=jnp.float32)
    out2 = jax.block_until_ready(
        cnn_text_classifier_forward(x_big, conv_w, conv_b, lin_w, lin_b,
                                    kernel_length=K, pooling_height=P))
    ref2 = reference_forward(x_big, conv_w, conv_b, lin_w, lin_b,
                             kernel_length=K, pooling_height=P)
    np.testing.assert_allclose(np.asarray(out2), np.asarray(ref2), rtol=3e-2, atol=3e-2)

    print("KERNEL_OK")
</pallas_src>

<mosaic_0001>
module attributes {stable_mosaic.version = 11 : i64} {
  func.func @_cnn_text_kernel(%arg0: i32, %arg1: memref<1x176x128xbf16, #tpu.memory_space<vmem>>, %arg2: memref<3x128x128xbf16, #tpu.memory_space<vmem>>, %arg3: memref<1x128xf32, #tpu.memory_space<vmem>>, %arg4: memref<3x128x128xbf16, #tpu.memory_space<vmem>>, %arg5: memref<1x128xf32, #tpu.memory_space<vmem>>, %arg6: memref<16x128xf32, #tpu.memory_space<vmem>>) attributes {dimension_semantics = [#tpu.dimension_semantics<parallel>], iteration_bounds = array<i64: 1>, scalar_prefetch = 0 : i64, scratch_operands = 0 : i64, tpu.core_type = #tpu.core_type<tc>, window_params = [{transform_indices = @transform_0, window_bounds = array<i64: 1, 176, 128>}, {pipeline_mode = #tpu.pipeline_mode<synchronous>, transform_indices = @transform_1, window_bounds = array<i64: 3, 128, 128>}, {pipeline_mode = #tpu.pipeline_mode<synchronous>, transform_indices = @transform_2, window_bounds = array<i64: 1, 128>}, {pipeline_mode = #tpu.pipeline_mode<synchronous>, transform_indices = @transform_3, window_bounds = array<i64: 3, 128, 128>}, {pipeline_mode = #tpu.pipeline_mode<synchronous>, transform_indices = @transform_4, window_bounds = array<i64: 1, 128>}, {transform_indices = @transform_5, window_bounds = array<i64: 16, 128>}]} {
    %c0 = arith.constant 0 : index
    %c0_0 = arith.constant 0 : index
    %c0_1 = arith.constant 0 : index
    %0 = vector.load %arg1[%c0, %c0_0, %c0_1] : memref<1x176x128xbf16, #tpu.memory_space<vmem>>, vector<1x144x128xbf16>
    %1 = vector.shape_cast %0 : vector<1x144x128xbf16> to vector<144x128xbf16>
    %c0_2 = arith.constant 0 : index
    %c0_3 = arith.constant 0 : index
    %c0_4 = arith.constant 0 : index
    %2 = vector.load %arg2[%c0_2, %c0_3, %c0_4] : memref<3x128x128xbf16, #tpu.memory_space<vmem>>, vector<1x128x128xbf16>
    %3 = vector.shape_cast %2 : vector<1x128x128xbf16> to vector<128x128xbf16>
    %cst = arith.constant dense<0.000000e+00> : vector<144x128xf32>
    %4 = tpu.matmul %1, %3, %cst {dimension_numbers = #tpu.dot_dimension_numbers<[1], [0], [0], [1], [0, 0, 1, 1], [], []>} : vector<144x128xbf16>, vector<128x128xbf16>, vector<144x128xf32> -> vector<144x128xf32>
    %c0_5 = arith.constant 0 : index
    %c16 = arith.constant 16 : index
    %c0_6 = arith.constant 0 : index
    %5 = vector.load %arg1[%c0_5, %c16, %c0_6] : memref<1x176x128xbf16, #tpu.memory_space<vmem>>, vector<1x144x128xbf16>
    %6 = vector.shape_cast %5 : vector<1x144x128xbf16> to vector<144x128xbf16>
    %c1 = arith.constant 1 : index
    %c0_7 = arith.constant 0 : index
    %c0_8 = arith.constant 0 : index
    %7 = vector.load %arg2[%c1, %c0_7, %c0_8] : memref<3x128x128xbf16, #tpu.memory_space<vmem>>, vector<1x128x128xbf16>
    %8 = vector.shape_cast %7 : vector<1x128x128xbf16> to vector<128x128xbf16>
    %cst_9 = arith.constant dense<0.000000e+00> : vector<144x128xf32>
    %9 = tpu.matmul %6, %8, %cst_9 {dimension_numbers = #tpu.dot_dimension_numbers<[1], [0], [0], [1], [0, 0, 1, 1], [], []>} : vector<144x128xbf16>, vector<128x128xbf16>, vector<144x128xf32> -> vector<144x128xf32>
    %10 = arith.addf %4, %9 : vector<144x128xf32>
    %c0_10 = arith.constant 0 : index
    %c32 = arith.constant 32 : index
    %c0_11 = arith.constant 0 : index
    %11 = vector.load %arg1[%c0_10, %c32, %c0_11] : memref<1x176x128xbf16, #tpu.memory_space<vmem>>, vector<1x144x128xbf16>
    %12 = vector.shape_cast %11 : vector<1x144x128xbf16> to vector<144x128xbf16>
    %c2 = arith.constant 2 : index
    %c0_12 = arith.constant 0 : index
    %c0_13 = arith.constant 0 : index
    %13 = vector.load %arg2[%c2, %c0_12, %c0_13] : memref<3x128x128xbf16, #tpu.memory_space<vmem>>, vector<1x128x128xbf16>
    %14 = vector.shape_cast %13 : vector<1x128x128xbf16> to vector<128x128xbf16>
    %cst_14 = arith.constant dense<0.000000e+00> : vector<144x128xf32>
    %15 = tpu.matmul %12, %14, %cst_14 {dimension_numbers = #tpu.dot_dimension_numbers<[1], [0], [0], [1], [0, 0, 1, 1], [], []>} : vector<144x128xbf16>, vector<128x128xbf16>, vector<144x128xf32> -> vector<144x128xf32>
    %16 = arith.addf %10, %15 : vector<144x128xf32>
    %c0_15 = arith.constant 0 : index
    %c0_16 = arith.constant 0 : index
    %17 = vector.load %arg3[%c0_15, %c0_16] : memref<1x128xf32, #tpu.memory_space<vmem>>, vector<1x128xf32>
    %18 = vector.broadcast %17 : vector<1x128xf32> to vector<144x128xf32>
    %19 = arith.addf %16, %18 : vector<144x128xf32>
    %cst_17 = arith.constant 0.000000e+00 : f32
    %20 = vector.broadcast %cst_17 : f32 to vector<144x128xf32>
    %21 = arith.maximumf %19, %20 : vector<144x128xf32>
    %22 = vector.extract_strided_slice %21 {offsets = [0, 0], sizes = [16, 128], strides = [1, 1]} : vector<144x128xf32> to vector<16x128xf32>
    %23 = vector.extract_strided_slice %21 {offsets = [16, 0], sizes = [16, 128], strides = [1, 1]} : vector<144x128xf32> to vector<16x128xf32>
    %24 = arith.maximumf %22, %23 : vector<16x128xf32>
    %25 = vector.extract_strided_slice %21 {offsets = [32, 0], sizes = [16, 128], strides = [1, 1]} : vector<144x128xf32> to vector<16x128xf32>
    %26 = arith.maximumf %24, %25 : vector<16x128xf32>
    %27 = arith.truncf %26 : vector<16x128xf32> to vector<16x128xbf16>
    %c0_18 = arith.constant 0 : index
    %c0_19 = arith.constant 0 : index
    %c0_20 = arith.constant 0 : index
    %28 = vector.load %arg4[%c0_18, %c0_19, %c0_20] : memref<3x128x128xbf16, #tpu.memory_space<vmem>>, vector<1x128x128xbf16>
    %29 = vector.shape_cast %28 : vector<1x128x128xbf16> to vector<128x128xbf16>
    %cst_21 = arith.constant dense<0.000000e+00> : vector<16x128xf32>
    %30 = tpu.matmul %27, %29, %cst_21 {dimension_numbers = #tpu.dot_dimension_numbers<[1], [0], [0], [1], [0, 0, 1, 1], [], []>} : vector<16x128xbf16>, vector<128x128xbf16>, vector<16x128xf32> -> vector<16x128xf32>
    %31 = vector.extract_strided_slice %21 {offsets = [48, 0], sizes = [16, 128], strides = [1, 1]} : vector<144x128xf32> to vector<16x128xf32>
    %32 = vector.extract_strided_slice %21 {offsets = [64, 0], sizes = [16, 128], strides = [1, 1]} : vector<144x128xf32> to vector<16x128xf32>
    %33 = arith.maximumf %31, %32 : vector<16x128xf32>
    %34 = vector.extract_strided_slice %21 {offsets = [80, 0], sizes = [16, 128], strides = [1, 1]} : vector<144x128xf32> to vector<16x128xf32>
    %35 = arith.maximumf %33, %34 : vector<16x128xf32>
    %36 = arith.truncf %35 : vector<16x128xf32> to vector<16x128xbf16>
    %c1_22 = arith.constant 1 : index
    %c0_23 = arith.constant 0 : index
    %c0_24 = arith.constant 0 : index
    %37 = vector.load %arg4[%c1_22, %c0_23, %c0_24] : memref<3x128x128xbf16, #tpu.memory_space<vmem>>, vector<1x128x128xbf16>
    %38 = vector.shape_cast %37 : vector<1x128x128xbf16> to vector<128x128xbf16>
    %cst_25 = arith.constant dense<0.000000e+00> : vector<16x128xf32>
    %39 = tpu.matmul %36, %38, %cst_25 {dimension_numbers = #tpu.dot_dimension_numbers<[1], [0], [0], [1], [0, 0, 1, 1], [], []>} : vector<16x128xbf16>, vector<128x128xbf16>, vector<16x128xf32> -> vector<16x128xf32>
    %40 = arith.addf %30, %39 : vector<16x128xf32>
    %41 = vector.extract_strided_slice %21 {offsets = [96, 0], sizes = [16, 128], strides = [1, 1]} : vector<144x128xf32> to vector<16x128xf32>
    %42 = vector.extract_strided_slice %21 {offsets = [112, 0], sizes = [16, 128], strides = [1, 1]} : vector<144x128xf32> to vector<16x128xf32>
    %43 = arith.maximumf %41, %42 : vector<16x128xf32>
    %44 = vector.extract_strided_slice %21 {offsets = [128, 0], sizes = [16, 128], strides = [1, 1]} : vector<144x128xf32> to vector<16x128xf32>
    %45 = arith.maximumf %43, %44 : vector<16x128xf32>
    %46 = arith.truncf %45 : vector<16x128xf32> to vector<16x128xbf16>
    %c2_26 = arith.constant 2 : index
    %c0_27 = arith.constant 0 : index
    %c0_28 = arith.constant 0 : index
    %47 = vector.load %arg4[%c2_26, %c0_27, %c0_28] : memref<3x128x128xbf16, #tpu.memory_space<vmem>>, vector<1x128x128xbf16>
    %48 = vector.shape_cast %47 : vector<1x128x128xbf16> to vector<128x128xbf16>
    %cst_29 = arith.constant dense<0.000000e+00> : vector<16x128xf32>
    %49 = tpu.matmul %46, %48, %cst_29 {dimension_numbers = #tpu.dot_dimension_numbers<[1], [0], [0], [1], [0, 0, 1, 1], [], []>} : vector<16x128xbf16>, vector<128x128xbf16>, vector<16x128xf32> -> vector<16x128xf32>
    %50 = arith.addf %40, %49 : vector<16x128xf32>
    %c0_30 = arith.constant 0 : index
    %c0_31 = arith.constant 0 : index
    %51 = vector.load %arg5[%c0_30, %c0_31] : memref<1x128xf32, #tpu.memory_space<vmem>>, vector<1x128xf32>
    %52 = vector.broadcast %51 : vector<1x128xf32> to vector<16x128xf32>
    %53 = arith.addf %50, %52 : vector<16x128xf32>
    %c0_32 = arith.constant 0 : index
    %c0_33 = arith.constant 0 : index
    %54 = vector.load %arg6[%c0_32, %c0_33] : memref<16x128xf32, #tpu.memory_space<vmem>>, vector<16x128xf32>
    tpu.vector_store %arg6[%c0_32, %c0_33], %53 {strides = array<i32>} : memref<16x128xf32, #tpu.memory_space<vmem>>, vector<16x128xf32>,
    return
  }
  func.func @transform_0(%arg0: i32) -> (i32, i32, i32) {
    %c0_i32 = arith.constant 0 : i32
    %c0_i32_0 = arith.constant 0 : i32
    %c0_i32_1 = arith.constant 0 : i32
    return %arg0, %c0_i32, %c0_i32_0 : i32, i32, i32
  }
  func.func @transform_1(%arg0: i32) -> (i32, i32, i32) {
    %c0_i32 = arith.constant 0 : i32
    %c0_i32_0 = arith.constant 0 : i32
    %c0_i32_1 = arith.constant 0 : i32
    %c0_i32_2 = arith.constant 0 : i32
    return %c0_i32, %c0_i32_0, %c0_i32_1 : i32, i32, i32
  }
  func.func @transform_2(%arg0: i32) -> (i32, i32) {
    %c0_i32 = arith.constant 0 : i32
    %c0_i32_0 = arith.constant 0 : i32
    %c0_i32_1 = arith.constant 0 : i32
    return %c0_i32, %c0_i32_0 : i32, i32
  }
  func.func @transform_3(%arg0: i32) -> (i32, i32, i32) {
    %c0_i32 = arith.constant 0 : i32
    %c0_i32_0 = arith.constant 0 : i32
    %c0_i32_1 = arith.constant 0 : i32
    %c0_i32_2 = arith.constant 0 : i32
    return %c0_i32, %c0_i32_0, %c0_i32_1 : i32, i32, i32
  }
  func.func @transform_4(%arg0: i32) -> (i32, i32) {
    %c0_i32 = arith.constant 0 : i32
    %c0_i32_0 = arith.constant 0 : i32
    %c0_i32_1 = arith.constant 0 : i32
    return %c0_i32, %c0_i32_0 : i32, i32
  }
  func.func @transform_5(%arg0: i32) -> (i32, i32) {
    %c0_i32 = arith.constant 0 : i32
    %c0_i32_0 = arith.constant 0 : i32
    return %arg0, %c0_i32 : i32, i32
  }
}

</mosaic_0001>

<bundles_post_ra>
// kernel: tpu_custom_call.1
= control target key start
LH: loop header
LB: loop body
LE: loop exit
PB: predicated region body
PF: predicated region fallthrough
CT: control target
= control target key end

     0   :  { %10 = vsyncpa [#allocation3], 0  ;;  %s1983_s0 = inlined_call_operand.hbm [shape: bf16[1,176,128], index: 0, kind: input, shape index: {}]   ;;  %s1984_s1 = inlined_call_operand.hbm [shape: bf16[3,128,128], index: 1, kind: input, shape index: {}]   ;;  %s1985_s2 = inlined_call_operand.vmem [shape: f32[1,128], index: 2, kind: input, shape index: {}]   ;;  %s1986_s3 = inlined_call_operand.hbm [shape: bf16[3,128,128], index: 3, kind: input, shape index: {}]   ;;  %s1987_s4 = inlined_call_operand.vmem [shape: f32[1,128], index: 4, kind: input, shape index: {}]   ;;  %s1988_s5 = inlined_call_operand.hbm [shape: f32[16,128], index: 5, kind: output, shape index: {}]  }
   0x1   :  { %11 = vsyncpa [#allocation6], 0 }
   0x2   :  { %12 = vsyncpa [#allocation4], 0  ;;  %s1682_s18 = smov [#allocation5]   ;;  %s1683_s20 = smov [#allocation2]  }
   0x3   :  { %s30_s19 = sshll.u32 %s1682_s18, 4  ;;  %s18_s21 = sshll.u32 %s1683_s20, 4  ;;  %s31_s19 = int_to_ptr.vmem [resolvable:$true] %s30_s19  ;;  %s1722_s21 = int_to_ptr.vmem [resolvable:$true] %s18_s21 }
   0x4   :  { %s1588_s24 = scalar_lea.hbm %s1984_s1, 3072 }
   0x5   :  { %p1589_p0 = scmp.ne.s32.totalorder %s1984_s1, %s1588_s24  ;;  %p1592_p1 = scmp.lt.u32.totalorder %s1588_s24, %s1984_s1 }
   0x7   :  { %p1594_p2 = pnand %p1592_p1, %p1589_p0 }
   0x9   :  { %1597 = shalt.err (!%p1594_p2)
}
   0xa   :  { %s1598_s29 = scalar_lea.vmem %s31_s19, 3072  ;;  %p1603_p4 = scmp.lt.s32.totalorder %s31_s19, %s31_s19 }
   0xb   :  { %p1599_p3 = scmp.ne.s32.totalorder %s31_s19, %s1598_s29  ;;  %p1604_p5 = scmp.lt.s32.totalorder %s1598_s29, %s1598_s29 }
   0xd   :  { %p1605_p6 = por %p1604_p5, %p1603_p4 }
   0xf   :  { %p1606_p7 = pnand %p1605_p6, %p1599_p3 }
  0x11   :  { %1609 = shalt.err (!%p1606_p7)
}
  0x12   :  { %s1684_s30 = smov 64   ;;  %s1685_s6 = smov 4  }
  0x13   :  { %36 = dma.hbm_to_vmem [thread:$0]  %s1984_s1, 3072, %s31_s19, [#allocation6], %s1684_s30, %s1684_s30, %s1685_s6  }
  0x14   :  { %s1610_s11 = scalar_lea.hbm %s1983_s0, 1408 }
  0x15   :  { %p1611_p8 = scmp.ne.s32.totalorder %s1983_s0, %s1610_s11  ;;  %p1614_p9 = scmp.lt.u32.totalorder %s1610_s11, %s1983_s0 }
  0x17   :  { %p1616_p10 = pnand %p1614_p9, %p1611_p8 }
  0x19   :  { %1619 = shalt.err (!%p1616_p10)
}
  0x1a   :  { %s1620_s16 = scalar_lea.vmem %s1722_s21, 1408  ;;  %p1625_p12 = scmp.lt.s32.totalorder %s1722_s21, %s1722_s21 }
  0x1b   :  { %p1621_p11 = scmp.ne.s32.totalorder %s1722_s21, %s1620_s16  ;;  %p1626_p13 = scmp.lt.s32.totalorder %s1620_s16, %s1620_s16 }
  0x1d   :  { %p1627_p0 = por %p1626_p13, %p1625_p12 }
  0x1f   :  { %p1628_p1 = pnand %p1627_p0, %p1621_p11 }
  0x21   :  { %1631 = shalt.err (!%p1628_p1)
}
  0x22   :  { %24 = dma.hbm_to_vmem [thread:$0]  %s1983_s0, 1408, %s1722_s21, [#allocation3], %s1684_s30, %s1684_s30, %s1685_s6  }
  0x23   :  { %s1686_s18 = smov [#allocation7]   ;;  %s1632_s23 = scalar_lea.hbm %s1986_s3, 3072 }
  0x24   :  { %s44_s19 = sshll.u32 %s1686_s18, 4  ;;  %p1633_p2 = scmp.ne.s32.totalorder %s1986_s3, %s1632_s23  ;;  %s45_s19 = int_to_ptr.vmem [resolvable:$true] %s44_s19 }
  0x25   :  { %p1636_p3 = scmp.lt.u32.totalorder %s1632_s23, %s1986_s3 }
  0x27   :  { %p1638_p4 = pnand %p1636_p3, %p1633_p2 }
  0x29   :  { %1641 = shalt.err (!%p1638_p4)
}
  0x2a   :  { %s1642_s28 = scalar_lea.vmem %s45_s19, 3072  ;;  %p1647_p6 = scmp.lt.s32.totalorder %s45_s19, %s45_s19 }
  0x2b   :  { %p1643_p5 = scmp.ne.s32.totalorder %s45_s19, %s1642_s28  ;;  %p1648_p7 = scmp.lt.s32.totalorder %s1642_s28, %s1642_s28 }
  0x2d   :  { %p1649_p8 = por %p1648_p7, %p1647_p6 }
  0x2f   :  { %p1650_p9 = pnand %p1649_p8, %p1643_p5 }
  0x31   :  { %1653 = shalt.err (!%p1650_p9)
}
  0x32   :  { %50 = dma.hbm_to_vmem [thread:$0]  %s1986_s3, 3072, %s45_s19, [#allocation6], %s1684_s30, %s1684_s30, %s1685_s6  }
  0x33   :  { %1676 = dma.done.wait [#allocation3], 1408  }
  0x34   :  { %1677 = vsyncadd [#allocation3], 4294965888 }
  0x35   :  { %1678 = dma.done.wait [#allocation6], 6144  }
  0x36   :  { %1679 = vsyncadd [#allocation6], 4294961152  ;;  %v1687_v0 = vmov 0.0   ;;  %vm1688_vm0 = vmmov 0   ;;  %v1521_v1 = vld [vmem:[#allocation5 + $0x40] sm:$0xff]   ;;  %v1523_v3 = vld [vmem:[#allocation5 + $0x48] sm:$0xff]  }
  0x37   :  { %1295 = vmatprep.subr.bf16.mxu0 %v1687_v0  ;;  %1347 = vmatprep.subr.bf16.mxu1 %v1687_v0  ;;  %v1522_v2 = vld [vmem:[#allocation5] sm:$0xff]   ;;  %v1524_v4 = vld [vmem:[#allocation5 + $0x8] sm:$0xff]   ;;  %v1525_v5 = vld [vmem:[#allocation5 + $0x50] sm:$0xff]   ;;  %s1689_s6 = smov [#allocation8]  }
  0x38   :  { %1311 = vmatprep.mubr.msk.bf16.mxu0 %vm1688_vm0, %v1687_v0  ;;  %1363 = vmatprep.mubr.msk.bf16.mxu1 %vm1688_vm0, %v1687_v0  ;;  %v1526_v6 = vld [vmem:[#allocation5 + $0x10] sm:$0xff]   ;;  %v1527_v7 = vld [vmem:[#allocation5 + $0x58] sm:$0xff]   ;;  %v1529_v9 = vld [vmem:[#allocation5 + $0x60] sm:$0xff]   ;;  %s1135_s7 = sshll.u32 %s1689_s6, 4  ;;  %s1136_s7 = int_to_ptr.vmem [resolvable:$true] %s1135_s7 }
  0x39   :  { %1296 = vmatpush3.bf16.msra.mxu0 %v1521_v1  ;;  %1348 = vmatpush3.bf16.msra.mxu1 %v1522_v2  ;;  %v1528_v8 = vld [vmem:[#allocation5 + $0x18] sm:$0xff]   ;;  %v1530_v10 = vld [vmem:[#allocation5 + $0x20] sm:$0xff]   ;;  %v1531_v11 = vld [vmem:[#allocation5 + $0x68] sm:$0xff]   ;;  %s1654_s8 = scalar_lea.vmem %s1136_s7, 256  ;;  %p1659_p11 = scmp.lt.s32.totalorder %s1136_s7, %s1136_s7 }
  0x3a   :  { %1297 = vmatprep.subr.bf16.mxu0 %v1687_v0  ;;  %1349 = vmatprep.subr.bf16.mxu1 %v1687_v0  ;;  %v1532_v12 = vld [vmem:[#allocation5 + $0x28] sm:$0xff]   ;;  %v1533_v13 = vld [vmem:[#allocation5 + $0x70] sm:$0xff]   ;;  %v1535_v15 = vld [vmem:[#allocation5 + $0x78] sm:$0xff]   ;;  %p1655_p10 = scmp.ne.s32.totalorder %s1136_s7, %s1654_s8  ;;  %p1660_p12 = scmp.lt.s32.totalorder %s1654_s8, %s1654_s8 }
  0x3b   :  { %v1534_v14 = vld [vmem:[#allocation5 + $0x30] sm:$0xff]   ;;  %v1536_v16 = vld [vmem:[#allocation5 + $0x38] sm:$0xff]   ;;  %v1538_v18 = vld [vmem:[#allocation2] sm:$0xff]  }
  0x3c   :  { %v1537_v17 = vld [vmem:[#allocation2 + $0x8] sm:$0xff]   ;;  %v1539_v19 = vld [vmem:[#allocation5 + $0x80] sm:$0xff]   ;;  %v1541_v20 = vld [vmem:[#allocation5 + $0x88] sm:$0xff]   ;;  %p1661_p13 = por %p1660_p12, %p1659_p11 }
  0x3d   :  { %1298 = vmatpush3.bf16.msra.mxu0 %v1523_v3  ;;  %1350 = vmatpush3.bf16.msra.mxu1 %v1524_v4  ;;  %v1540_v21 = vld [vmem:[#allocation2 + $0x10] sm:$0xff]   ;;  %v1543_v22 = vld [vmem:[#allocation5 + $0x90] sm:$0xff]   ;;  %v1542_v24 = vld [vmem:[#allocation2 + $0x18] sm:$0xff]  }
  0x3e   :  { %1299 = vmatprep.subr.bf16.mxu0 %v1687_v0  ;;  %1351 = vmatprep.subr.bf16.mxu1 %v1687_v0  ;;  %v1545_v23 = vld [vmem:[#allocation5 + $0x98] sm:$0xff]   ;;  %v1547_v25 = vld [vmem:[#allocation5 + $0xa0] sm:$0xff]   ;;  %v1549_v26 = vld [vmem:[#allocation5 + $0xa8] sm:$0xff]   ;;  %p1662_p0 = pnand %p1661_p13, %p1655_p10 }
  0x3f   :  { %v1544_v27 = vld [vmem:[#allocation2 + $0x20] sm:$0xff]   ;;  %v1551_v28 = vld [vmem:[#allocation5 + $0xb0] sm:$0xff]   ;;  %v1554_v29 = vld [vmem:[#allocation5 + $0xb8] sm:$0xff]  }
  0x40   :  { %v1546_v30 = vld [vmem:[#allocation2 + $0x28] sm:$0xff]   ;;  %v1548_v31 = vld [vmem:[#allocation2 + $0x30] sm:$0xff]   ;;  %v1550_v32 = vld [vmem:[#allocation2 + $0x38] sm:$0xff]  }
  0x41   :  { %1300 = vmatpush3.bf16.msra.mxu0 %v1525_v5  ;;  %1352 = vmatpush3.bf16.msra.mxu1 %v1526_v6  ;;  %v1552_v33 = vld [vmem:[#allocation2 + $0x40] sm:$0xff]   ;;  %v1553_v34 = vld [vmem:[#allocation2 + $0x48] sm:$0xff]   ;;  %v1555_v35 = vld [vmem:[#allocation2 + $0x10] sm:$0xff]  }
  0x42   :  { %1301 = vmatprep.subr.bf16.mxu0 %v1687_v0  ;;  %1353 = vmatprep.subr.bf16.mxu1 %v1687_v0  ;;  %v1556_v36 = vld [vmem:[#allocation2 + $0x18] sm:$0xff]   ;;  %v1557_v37 = vld [vmem:[#allocation2 + $0x20] sm:$0xff]   ;;  %v1558_v38 = vld [vmem:[#allocation2 + $0x28] sm:$0xff]  }
  0x43   :  { %v1559_v39 = vld [vmem:[#allocation2 + $0x30] sm:$0xff]   ;;  %v1560_v40 = vld [vmem:[#allocation2 + $0x38] sm:$0xff]   ;;  %v1561_v41 = vld [vmem:[#allocation2 + $0x40] sm:$0xff]  }
  0x44   :  { %v1562_v42 = vld [vmem:[#allocation2 + $0x48] sm:$0xff]   ;;  %v1563_v43 = vld [vmem:[#allocation2 + $0x50] sm:$0xff]   ;;  %v1564_v44 = vld [vmem:[#allocation7 + $0x40] sm:$0xff]  }
  0x45   :  { %1302 = vmatpush3.bf16.msra.mxu0 %v1527_v7  ;;  %1354 = vmatpush3.bf16.msra.mxu1 %v1528_v8  ;;  %v1565_v45 = vld [vmem:[#allocation7 + $0x48] sm:$0xff]   ;;  %v1566_v46 = vld [vmem:[#allocation7 + $0x50] sm:$0xff]   ;;  %v1567_v47 = vld [vmem:[#allocation7 + $0x58] sm:$0xff]  }
  0x46   :  { %1303 = vmatprep.subr.bf16.mxu0 %v1687_v0  ;;  %1355 = vmatprep.subr.bf16.mxu1 %v1687_v0  ;;  %v1568_v48 = vld [vmem:[#allocation7 + $0x60] sm:$0xff]   ;;  %v1569_v49 = vld [vmem:[#allocation7 + $0x68] sm:$0xff]   ;;  %v1570_v50 = vld [vmem:[#allocation7 + $0x70] sm:$0xff]  }
  0x47   :  { %v1571_v51 = vld [vmem:[#allocation7 + $0x78] sm:$0xff]  }
  0x49   :  { %1304 = vmatpush3.bf16.msra.mxu0 %v1529_v9  ;;  %1356 = vmatpush3.bf16.msra.mxu1 %v1530_v10 }
  0x4a   :  { %1305 = vmatprep.subr.bf16.mxu0 %v1687_v0  ;;  %1357 = vmatprep.subr.bf16.mxu1 %v1687_v0 }
  0x4d   :  { %1306 = vmatpush3.bf16.msra.mxu0 %v1531_v11  ;;  %1358 = vmatpush3.bf16.msra.mxu1 %v1532_v12 }
  0x4e   :  { %1307 = vmatprep.subr.bf16.mxu0 %v1687_v0  ;;  %1359 = vmatprep.subr.bf16.mxu1 %v1687_v0 }
  0x51   :  { %1308 = vmatpush3.bf16.msra.mxu0 %v1533_v13  ;;  %1360 = vmatpush3.bf16.msra.mxu1 %v1534_v14 }
  0x52   :  { %1309 = vmatprep.subr.bf16.mxu0 %v1687_v0  ;;  %1361 = vmatprep.subr.bf16.mxu1 %v1687_v0 }
  0x55   :  { %1310 = vmatpush3.bf16.msra.mxu0 %v1535_v15  ;;  %1362 = vmatpush3.bf16.msra.mxu1 %v1536_v16 }
  0x56   :  { %1399 = vmatprep.subr.bf16.mxu0 %v1687_v0  ;;  %1451 = vmatprep.subr.bf16.mxu1 %v1687_v0 }
  0x58   :  { %1312 = vmatmul.mubr.bf16.vlgmr.msra.gmra.mrb[0].mxu0 %v1537_v17  ;;  %1364 = vmatmul.mubr.bf16.vlgmr.msra.gmra.mrb[0].mxu1 %v1538_v18 }
  0x59   :  { %1400 = vmatpush3.bf16.msra.mxu0 %v1539_v19  ;;  %1315 = vmatprep.mubr.msk.bf16.mxu0 %vm1688_vm0, %v1687_v0 }
  0x5a   :  { %1367 = vmatprep.mubr.msk.bf16.mxu1 %vm1688_vm0, %v1687_v0  ;;  %1401 = vmatprep.subr.bf16.mxu0 %v1687_v0 }
  0x5b   :  { %1452 = vmatpush3.bf16.msra.mxu1 %v1564_v44 }
  0x5c   :  { %1453 = vmatprep.subr.bf16.mxu1 %v1687_v0 }
  0x5d   :  { %1402 = vmatpush3.bf16.msra.mxu0 %v1541_v20 }
  0x5e   :  { %1403 = vmatprep.subr.bf16.mxu0 %v1687_v0 }
  0x5f   :  { %1454 = vmatpush3.bf16.msra.mxu1 %v1565_v45 }
  0x60   :  { %1316 = vmatmul.mubr.bf16.gmra.mrb[4].mxu0 %v1540_v21  ;;  %1368 = vmatmul.mubr.bf16.gmra.mrb[4].mxu1 %v1537_v17 }
  0x61   :  { %1319 = vmatprep.mubr.msk.bf16.mxu0 %vm1688_vm0, %v1687_v0  ;;  %1371 = vmatprep.mubr.msk.bf16.mxu1 %vm1688_vm0, %v1687_v0 }
  0x62   :  { %1404 = vmatpush3.bf16.msra.mxu0 %v1543_v22  ;;  %1455 = vmatprep.subr.bf16.mxu1 %v1687_v0 }
  0x63   :  { %1405 = vmatprep.subr.bf16.mxu0 %v1687_v0  ;;  %1456 = vmatpush3.bf16.msra.mxu1 %v1566_v46 }
  0x64   :  { %1457 = vmatprep.subr.bf16.mxu1 %v1687_v0 }
  0x66   :  { %1406 = vmatpush3.bf16.msra.mxu0 %v1545_v23 }
  0x67   :  { %1407 = vmatprep.subr.bf16.mxu0 %v1687_v0  ;;  %1458 = vmatpush3.bf16.msra.mxu1 %v1567_v47 }
  0x68   :  { %1320 = vmatmul.mubr.bf16.gmra.mrb[8].mxu0 %v1542_v24  ;;  %1372 = vmatmul.mubr.bf16.gmra.mrb[8].mxu1 %v1540_v21 }
  0x69   :  { %1323 = vmatprep.mubr.msk.bf16.mxu0 %vm1688_vm0, %v1687_v0  ;;  %1375 = vmatprep.mubr.msk.bf16.mxu1 %vm1688_vm0, %v1687_v0 }
  0x6a   :  { %1408 = vmatpush3.bf16.msra.mxu0 %v1547_v25  ;;  %1459 = vmatprep.subr.bf16.mxu1 %v1687_v0 }
  0x6b   :  { %1409 = vmatprep.subr.bf16.mxu0 %v1687_v0  ;;  %1460 = vmatpush3.bf16.msra.mxu1 %v1568_v48 }
  0x6c   :  { %1461 = vmatprep.subr.bf16.mxu1 %v1687_v0 }
  0x6e   :  { %1410 = vmatpush3.bf16.msra.mxu0 %v1549_v26 }
  0x6f   :  { %1411 = vmatprep.subr.bf16.mxu0 %v1687_v0  ;;  %1462 = vmatpush3.bf16.msra.mxu1 %v1569_v49 }
  0x70   :  { %1324 = vmatmul.mubr.bf16.gmra.mrb[12].mxu0 %v1544_v27  ;;  %1376 = vmatmul.mubr.bf16.gmra.mrb[12].mxu1 %v1542_v24 }
  0x71   :  { %1327 = vmatprep.mubr.msk.bf16.mxu0 %vm1688_vm0, %v1687_v0  ;;  %1379 = vmatprep.mubr.msk.bf16.mxu1 %vm1688_vm0, %v1687_v0 }
  0x72   :  { %1412 = vmatpush3.bf16.msra.mxu0 %v1551_v28  ;;  %1463 = vmatprep.subr.bf16.mxu1 %v1687_v0 }
  0x73   :  { %1413 = vmatprep.subr.bf16.mxu0 %v1687_v0  ;;  %1464 = vmatpush3.bf16.msra.mxu1 %v1570_v50 }
  0x74   :  { %1465 = vmatprep.subr.bf16.mxu1 %v1687_v0 }
  0x76   :  { %1414 = vmatpush3.bf16.msra.mxu0 %v1554_v29 }
  0x77   :  { %1466 = vmatpush3.bf16.msra.mxu1 %v1571_v51 }
  0x78   :  { %1328 = vmatmul.mubr.bf16.gmra.mrb[16].mxu0 %v1546_v30  ;;  %1380 = vmatmul.mubr.bf16.gmra.mrb[16].mxu1 %v1544_v27 }
  0x79   :  { %1331 = vmatprep.mubr.msk.bf16.mxu0 %vm1688_vm0, %v1687_v0  ;;  %1383 = vmatprep.mubr.msk.bf16.mxu1 %vm1688_vm0, %v1687_v0 }
  0x7a   :  { %1471 = vmatprep.subr.bf16.mxu1 %v1687_v0 }
  0x80   :  { %1332 = vmatmul.mubr.bf16.gmra.mrb[20].mxu0 %v1548_v31  ;;  %1384 = vmatmul.mubr.bf16.gmra.mrb[20].mxu1 %v1546_v30 }
  0x81   :  { %1335 = vmatprep.mubr.msk.bf16.mxu0 %vm1688_vm0, %v1687_v0  ;;  %1387 = vmatprep.mubr.msk.bf16.mxu1 %vm1688_vm0, %v1687_v0 }
  0x88   :  { %1336 = vmatmul.mubr.bf16.gmra.mrb[24].mxu0 %v1550_v32  ;;  %1388 = vmatmul.mubr.bf16.gmra.mrb[24].mxu1 %v1548_v31 }
  0x89   :  { %1339 = vmatprep.mubr.msk.bf16.mxu0 %vm1688_vm0, %v1687_v0  ;;  %1391 = vmatprep.mubr.msk.bf16.mxu1 %vm1688_vm0, %v1687_v0 }
  0x90   :  { %1340 = vmatmul.mubr.bf16.gmra.mrb[28].mxu0 %v1552_v33  ;;  %1392 = vmatmul.mubr.bf16.gmra.mrb[28].mxu1 %v1550_v32 }
  0x91   :  { %1343 = vmatprep.mubr.msk.bf16.mxu0 %vm1688_vm0, %v1687_v0  ;;  %1395 = vmatprep.mubr.msk.bf16.mxu1 %vm1688_vm0, %v1687_v0 }
  0x98   :  { %1344 = vmatmul.mubr.bf16.gmra.mrb[32].mxu0 %v1553_v34  ;;  %1396 = vmatmul.mubr.bf16.gmra.mrb[32].mxu1 %v1552_v33 }
  0x99   :  { %1415 = vmatprep.mubr.msk.bf16.mxu0 %vm1688_vm0, %v1687_v0  ;;  %1467 = vmatprep.mubr.msk.bf16.mxu1 %vm1688_vm0, %v1687_v0 }
  0xa0   :  { %1416 = vmatmul.mubr.bf16.vlgmr.msra.gmra.mrb[36].mxu0 %v1555_v35 }
  0xa1   :  { %1419 = vmatprep.mubr.msk.bf16.mxu0 %vm1688_vm0, %v1687_v0 }
  0xa8   :  { %1420 = vmatmul.mubr.bf16.gmra.mrb[40].mxu0 %v1556_v36 }
  0xa9   :  { %1423 = vmatprep.mubr.msk.bf16.mxu0 %vm1688_vm0, %v1687_v0 }
  0xb0   :  { %1424 = vmatmul.mubr.bf16.gmra.mrb[44].mxu0 %v1557_v37 }
  0xb1   :  { %1427 = vmatprep.mubr.msk.bf16.mxu0 %vm1688_vm0, %v1687_v0 }
  0xb8   :  { %1428 = vmatmul.mubr.bf16.gmra.mrb[48].mxu0 %v1558_v38 }
  0xb9   :  { %1431 = vmatprep.mubr.msk.bf16.mxu0 %vm1688_vm0, %v1687_v0 }
  0xc0   :  { %1432 = vmatmul.mubr.bf16.gmra.mrb[52].mxu0 %v1559_v39 }
  0xc1   :  { %1435 = vmatprep.mubr.msk.bf16.mxu0 %vm1688_vm0, %v1687_v0 }
  0xc8   :  { %1436 = vmatmul.mubr.bf16.gmra.mrb[56].mxu0 %v1560_v40 }
  0xc9   :  { %1439 = vmatprep.mubr.msk.bf16.mxu0 %vm1688_vm0, %v1687_v0 }
  0xd0   :  { %1440 = vmatmul.mubr.bf16.gmra.mrb[60].mxu0 %v1561_v41 }
  0xd1   :  { %1443 = vmatprep.mubr.msk.bf16.mxu0 %vm1688_vm0, %v1687_v0 }
  0xd8   :  { %1444 = vmatmul.mubr.bf16.gmra.mrb[64].mxu0 %v1562_v42 }
  0xd9   :  { %1447 = vmatprep.mubr.msk.bf16.mxu0 %vm1688_vm0, %v1687_v0 }
  0xe0   :  { %1448 = vmatmul.mubr.bf16.gmra.mrb[68].mxu0 %v1563_v43 }
 0x12b   :  { %v252_v52 = vpop.f32.mrb[0].mxu0  ;;  %v411_v53 = vpop.f32.mrb[0].mxu1 }
 0x12c   :  { %v1313_v54 = vpop.f32.mrb[1].mxu0  ;;  %v1863_v55 = vadd.f32 %v411_v53, %v252_v52  ;;  %v1365_v56 = vpop.f32.mrb[1].mxu1 }
 0x12d   :  { %v255_v57 = vpop.f32.mrb[2].mxu0  ;;  %v414_v58 = vpop.f32.mrb[2].mxu1 }
 0x12e   :  { %v1314_v59 = vpop.f32.mrb[3].mxu0  ;;  %v1865_v60 = vadd.f32 %v414_v58, %v255_v57  ;;  %v1366_v61 = vpop.f32.mrb[3].mxu1 }
 0x133   :  { %v260_v62 = vpop.f32.mrb[4].mxu0  ;;  %v419_v63 = vpop.f32.mrb[4].mxu1 }
 0x134   :  { %v1317_v1 = vpop.f32.mrb[5].mxu0  ;;  %v1867_v2 = vadd.f32 %v419_v63, %v260_v62  ;;  %v1369_v3 = vpop.f32.mrb[5].mxu1 }
 0x135   :  { %v263_v4 = vpop.f32.mrb[6].mxu0  ;;  %v422_v5 = vpop.f32.mrb[6].mxu1 }
 0x136   :  { %v1318_v6 = vpop.f32.mrb[7].mxu0  ;;  %v1869_v7 = vadd.f32 %v422_v5, %v263_v4  ;;  %v1370_v8 = vpop.f32.mrb[7].mxu1 }
 0x13b   :  { %v268_v9 = vpop.f32.mrb[8].mxu0  ;;  %v427_v10 = vpop.f32.mrb[8].mxu1 }
 0x13c   :  { %v1321_v11 = vpop.f32.mrb[9].mxu0  ;;  %v1871_v12 = vadd.f32 %v427_v10, %v268_v9  ;;  %v1373_v13 = vpop.f32.mrb[9].mxu1 }
 0x13d   :  { %v271_v14 = vpop.f32.mrb[10].mxu0  ;;  %v430_v15 = vpop.f32.mrb[10].mxu1 }
 0x13e   :  { %v1322_v16 = vpop.f32.mrb[11].mxu0  ;;  %v1873_v17 = vadd.f32 %v430_v15, %v271_v14  ;;  %v1374_v18 = vpop.f32.mrb[11].mxu1 }
 0x143   :  { %v276_v19 = vpop.f32.mrb[12].mxu0  ;;  %v435_v20 = vpop.f32.mrb[12].mxu1 }
 0x144   :  { %v1325_v21 = vpop.f32.mrb[13].mxu0  ;;  %v1875_v22 = vadd.f32 %v435_v20, %v276_v19  ;;  %v1377_v23 = vpop.f32.mrb[13].mxu1 }
 0x145   :  { %v279_v24 = vpop.f32.mrb[14].mxu0  ;;  %v438_v25 = vpop.f32.mrb[14].mxu1 }
 0x146   :  { %v1326_v26 = vpop.f32.mrb[15].mxu0  ;;  %v1877_v27 = vadd.f32 %v438_v25, %v279_v24  ;;  %v1378_v28 = vpop.f32.mrb[15].mxu1 }
 0x14b   :  { %v284_v29 = vpop.f32.mrb[16].mxu0  ;;  %v443_v30 = vpop.f32.mrb[16].mxu1 }
 0x14c   :  { %v1329_v31 = vpop.f32.mrb[17].mxu0  ;;  %v1879_v32 = vadd.f32 %v443_v30, %v284_v29  ;;  %v1381_v33 = vpop.f32.mrb[17].mxu1  ;;  %v1904_v30 = vld [vmem:[%s1985_s2] ss:$0 sm:$0xff] }
 0x14d   :  { %v287_v34 = vpop.f32.mrb[18].mxu0  ;;  %v446_v35 = vpop.f32.mrb[18].mxu1 }
 0x14e   :  { %v1330_v36 = vpop.f32.mrb[19].mxu0  ;;  %v1881_v37 = vadd.f32 %v446_v35, %v287_v34  ;;  %v1382_v38 = vpop.f32.mrb[19].mxu1 }
 0x153   :  { %v292_v39 = vpop.f32.mrb[20].mxu0  ;;  %v451_v40 = vpop.f32.mrb[20].mxu1 }
 0x154   :  { %v1333_v41 = vpop.f32.mrb[21].mxu0  ;;  %v1883_v42 = vadd.f32 %v451_v40, %v292_v39  ;;  %v1385_v43 = vpop.f32.mrb[21].mxu1 }
 0x155   :  { %v295_v44 = vpop.f32.mrb[22].mxu0  ;;  %v454_v45 = vpop.f32.mrb[22].mxu1 }
 0x156   :  { %v1334_v46 = vpop.f32.mrb[23].mxu0  ;;  %v1885_v47 = vadd.f32 %v454_v45, %v295_v44  ;;  %v1386_v48 = vpop.f32.mrb[23].mxu1 }
 0x15b   :  { %v300_v49 = vpop.f32.mrb[24].mxu0  ;;  %v459_v50 = vpop.f32.mrb[24].mxu1 }
 0x15c   :  { %v1337_v51 = vpop.f32.mrb[25].mxu0  ;;  %v1887_v52 = vadd.f32 %v459_v50, %v300_v49  ;;  %v1389_v53 = vpop.f32.mrb[25].mxu1 }
 0x15d   :  { %v303_v54 = vpop.f32.mrb[26].mxu0  ;;  %v462_v56 = vpop.f32.mrb[26].mxu1 }
 0x15e   :  { %v1338_v57 = vpop.f32.mrb[27].mxu0  ;;  %v1889_v58 = vadd.f32 %v462_v56, %v303_v54  ;;  %v1390_v59 = vpop.f32.mrb[27].mxu1 }
 0x163   :  { %v308_v61 = vpop.f32.mrb[28].mxu0  ;;  %v467_v62 = vpop.f32.mrb[28].mxu1 }
 0x164   :  { %v1341_v63 = vpop.f32.mrb[29].mxu0  ;;  %v1891_v1 = vadd.f32 %v467_v62, %v308_v61  ;;  %v1393_v3 = vpop.f32.mrb[29].mxu1 }
 0x165   :  { %v311_v4 = vpop.f32.mrb[30].mxu0  ;;  %v470_v5 = vpop.f32.mrb[30].mxu1 }
 0x166   :  { %v1342_v6 = vpop.f32.mrb[31].mxu0  ;;  %v1893_v8 = vadd.f32 %v470_v5, %v311_v4  ;;  %v1394_v9 = vpop.f32.mrb[31].mxu1 }
 0x16b   :  { %v316_v10 = vpop.f32.mrb[32].mxu0  ;;  %v475_v11 = vpop.f32.mrb[32].mxu1 }
 0x16c   :  { %v1345_v13 = vpop.f32.mrb[33].mxu0  ;;  %v1895_v14 = vadd.f32 %v475_v11, %v316_v10  ;;  %v1397_v15 = vpop.f32.mrb[33].mxu1 }
 0x16d   :  { %v319_v16 = vpop.f32.mrb[34].mxu0  ;;  %v478_v18 = vpop.f32.mrb[34].mxu1 }
 0x16e   :  { %v1346_v19 = vpop.f32.mrb[35].mxu0  ;;  %v1897_v20 = vadd.f32 %v478_v18, %v319_v16  ;;  %v1398_v21 = vpop.f32.mrb[35].mxu1 }
 0x173   :  { %v653_v23 = vpop.f32.mrb[36].mxu0 }
 0x174   :  { %v724_v24 = vadd.f32 %v653_v23, %v1863_v55  ;;  %v1417_v25 = vpop.f32.mrb[37].mxu0 }
 0x175   :  { %v656_v26 = vpop.f32.mrb[38].mxu0 }
 0x176   :  { %v725_v28 = vadd.f32 %v656_v26, %v1865_v60  ;;  %v1418_v29 = vpop.f32.mrb[39].mxu0  ;;  %v749_v33 = vadd.f32 %v1904_v30, %v724_v24 }
 0x178   :  { %v750_v38 = vadd.f32 %v1904_v30, %v725_v28  ;;  %v767_v40 = vmax.f32 %v749_v33, 0.0 }
 0x17a   :  { %v768_v44 = vmax.f32 %v750_v38, 0.0 }
 0x17b   :  { %v661_v31 = vpop.f32.mrb[40].mxu0 }
 0x17c   :  { %v726_v34 = vadd.f32 %v661_v31, %v1867_v2  ;;  %v1421_v35 = vpop.f32.mrb[41].mxu0 }
 0x17d   :  { %v664_v36 = vpop.f32.mrb[42].mxu0 }
 0x17e   :  { %v751_v55 = vadd.f32 %v1904_v30, %v726_v34  ;;  %v727_v39 = vadd.f32 %v664_v36, %v1869_v7  ;;  %v1422_v60 = vpop.f32.mrb[43].mxu0 }
 0x180   :  { %v769_v41 = vmax.f32 %v751_v55, 0.0  ;;  %v752_v43 = vadd.f32 %v1904_v30, %v727_v39 }
 0x182   :  { %v785_v45 = vmax.f32 %v767_v40, %v769_v41  ;;  %v770_v46 = vmax.f32 %v752_v43, 0.0 }
 0x183   :  { %v669_v48 = vpop.f32.mrb[44].mxu0 }
 0x184   :  { %v786_v49 = vmax.f32 %v768_v44, %v770_v46  ;;  %v728_v2 = vadd.f32 %v669_v48, %v1871_v12  ;;  %v1425_v50 = vpop.f32.mrb[45].mxu0 }
 0x185   :  { %v672_v51 = vpop.f32.mrb[46].mxu0 }
 0x186   :  { %v753_v53 = vadd.f32 %v1904_v30, %v728_v2  ;;  %v729_v54 = vadd.f32 %v672_v51, %v1873_v17  ;;  %v1426_v56 = vpop.f32.mrb[47].mxu0 }
 0x188   :  { %v771_v7 = vmax.f32 %v753_v53, 0.0  ;;  %v754_v57 = vadd.f32 %v1904_v30, %v729_v54  ;;  %v1574_v53 = vld [vmem:[#allocation7 + $0x10] sm:$0xff]  }
 0x18a   :  { %v1916_v59 = vmax.f32 %v785_v45, %v771_v7  ;;  %v772_v61 = vmax.f32 %v754_v57, 0.0  ;;  %v1572_v45 = vld [vmem:[#allocation7] sm:$0xff]  }
 0x18b   :  { %v677_v62 = vpop.f32.mrb[48].mxu0 }
 0x18c   :  { %v1918_v63 = vmax.f32 %v786_v49, %v772_v61  ;;  %v730_v3 = vadd.f32 %v677_v62, %v1875_v22  ;;  %v1429_v4 = vpop.f32.mrb[49].mxu0 }
 0x18d   :  { %v680_v12 = vpop.f32.mrb[50].mxu0 }
 0x18e   :  { %v789_v5 = vpack.c.bf16 %v1918_v63, %v1916_v59  ;;  %v731_v6 = vadd.f32 %v680_v12, %v1877_v27  ;;  %v1430_v17 = vpop.f32.mrb[51].mxu0  ;;  %v755_v10 = vadd.f32 %v1904_v30, %v730_v3  ;;  %v1575_v3 = vld [vmem:[#allocation7 + $0x18] sm:$0xff]   ;;  %v1585_v59 = vld [vmem:[#allocation7 + $0xa8] sm:$0xff]   ;;  %v1586_v63 = vld [vmem:[#allocation7 + $0xb0] sm:$0xff]  }
 0x190   :  { %v756_v16 = vadd.f32 %v1904_v30, %v731_v6  ;;  %v773_v21 = vmax.f32 %v755_v10, 0.0 }
 0x192   :  { %v774_v27 = vmax.f32 %v756_v16, 0.0 }
 0x193   :  { %v685_v9 = vpop.f32.mrb[52].mxu0 }
 0x194   :  { %v732_v11 = vadd.f32 %v685_v9, %v1879_v32  ;;  %v1433_v13 = vpop.f32.mrb[53].mxu0 }
 0x195   :  { %v688_v15 = vpop.f32.mrb[54].mxu0 }
 0x196   :  { %v757_v18 = vadd.f32 %v1904_v30, %v732_v11  ;;  %v733_v22 = vadd.f32 %v688_v15, %v1881_v37  ;;  %v1434_v19 = vpop.f32.mrb[55].mxu0  ;;  %v1576_v11 = vld [vmem:[#allocation7 + $0x20] sm:$0xff]  }
 0x197   :  { %v1577_v19 = vld [vmem:[#allocation7 + $0x28] sm:$0xff]  }
 0x198   :  { %v775_v23 = vmax.f32 %v757_v18, 0.0  ;;  %v758_v24 = vadd.f32 %v1904_v30, %v733_v22 }
 0x19a   :  { %v806_v25 = vmax.f32 %v773_v21, %v775_v23  ;;  %v776_v26 = vmax.f32 %v758_v24, 0.0  ;;  %v1578_v24 = vld [vmem:[#allocation7 + $0x30] sm:$0xff]  }
 0x19b   :  { %v693_v28 = vpop.f32.mrb[56].mxu0 }
 0x19c   :  { %v807_v29 = vmax.f32 %v774_v27, %v776_v26  ;;  %v734_v32 = vadd.f32 %v693_v28, %v1883_v42  ;;  %v1437_v31 = vpop.f32.mrb[57].mxu0  ;;  %v1582_v26 = vld [vmem:[#allocation7 + $0x90] sm:$0xff]   ;;  %v1583_v28 = vld [vmem:[#allocation7 + $0x98] sm:$0xff]  }
 0x19d   :  { %v696_v33 = vpop.f32.mrb[58].mxu0 }
 0x19e   :  { %v759_v34 = vadd.f32 %v1904_v30, %v734_v32  ;;  %v735_v35 = vadd.f32 %v696_v33, %v1885_v47  ;;  %v1438_v36 = vpop.f32.mrb[59].mxu0  ;;  %v1573_v47 = vld [vmem:[#allocation7 + $0x8] sm:$0xff]  }
 0x1a0   :  { %v777_v37 = vmax.f32 %v759_v34, 0.0  ;;  %v760_v38 = vadd.f32 %v1904_v30, %v735_v35 }
 0x1a2   :  { %v808_v55 = vmax.f32 %v806_v25, %v777_v37  ;;  %v778_v39 = vmax.f32 %v760_v38, 0.0  ;;  %v1580_v25 = vld [vmem:[#allocation7 + $0x80] sm:$0xff]  }
 0x1a3   :  { %v701_v60 = vpop.f32.mrb[60].mxu0 }
 0x1a4   :  { %v809_v40 = vmax.f32 %v807_v29, %v778_v39  ;;  %v736_v41 = vadd.f32 %v701_v60, %v1887_v52  ;;  %v1441_v43 = vpop.f32.mrb[61].mxu0  ;;  %v1584_v29 = vld [vmem:[#allocation7 + $0xa0] sm:$0xff]  }
 0x1a5   :  { %v704_v44 = vpop.f32.mrb[62].mxu0 }
 0x1a6   :  { %v810_v42 = vpack.c.bf16 %v809_v40, %v808_v55  ;;  %v737_v46 = vadd.f32 %v704_v44, %v1889_v58  ;;  %v1442_v48 = vpop.f32.mrb[63].mxu0  ;;  %v761_v2 = vadd.f32 %v1904_v30, %v736_v41  ;;  %v1216_v40 = vld [vmem:[%s1987_s4] ss:$0 sm:$0xff] }
 0x1a8   :  { %1468 = vmatmul.mubr.bf16.vlgmr.msra.gmra.mrb[36].mxu1 %v810_v42  ;;  %v762_v58 = vadd.f32 %v1904_v30, %v737_v46  ;;  %v779_v57 = vmax.f32 %v761_v2, 0.0 }
 0x1a9   :  { %1472 = vmatpush3.bf16.msra.mxu1 %v1572_v45  ;;  %1487 = vmatprep.mubr.msk.bf16.mxu1 %vm1688_vm0, %v1687_v0 }
 0x1aa   :  { %1473 = vmatprep.subr.bf16.mxu1 %v1687_v0 }
 0x1ab   :  { %v709_v49 = vpop.f32.mrb[64].mxu0 }
 0x1ac   :  { %v738_v52 = vadd.f32 %v709_v49, %v1891_v1  ;;  %v1445_v50 = vpop.f32.mrb[65].mxu0  ;;  %v780_v1 = vmax.f32 %v762_v58, 0.0 }
 0x1ad   :  { %1474 = vmatpush3.bf16.msra.mxu1 %v1573_v47  ;;  %v712_v51 = vpop.f32.mrb[66].mxu0 }
 0x1ae   :  { %v763_v54 = vadd.f32 %v1904_v30, %v738_v52  ;;  %v739_v56 = vadd.f32 %v712_v51, %v1893_v8  ;;  %1475 = vmatprep.subr.bf16.mxu1 %v1687_v0  ;;  %v1446_v7 = vpop.f32.mrb[67].mxu0 }
 0x1b0   :  { %v781_v61 = vmax.f32 %v763_v54, 0.0  ;;  %v764_v62 = vadd.f32 %v1904_v30, %v739_v56 }
 0x1b1   :  { %1476 = vmatpush3.bf16.msra.mxu1 %v1574_v53 }
 0x1b2   :  { %v1006_v4 = vmax.f32 %v779_v57, %v781_v61  ;;  %v782_v12 = vmax.f32 %v764_v62, 0.0  ;;  %1477 = vmatprep.subr.bf16.mxu1 %v1687_v0 }
 0x1b3   :  { %v717_v6 = vpop.f32.mrb[68].mxu0 }
 0x1b4   :  { %v1007_v17 = vmax.f32 %v780_v1, %v782_v12  ;;  %v740_v9 = vadd.f32 %v717_v6, %v1895_v14  ;;  %v1449_v10 = vpop.f32.mrb[69].mxu0 }
 0x1b5   :  { %1478 = vmatpush3.bf16.msra.mxu1 %v1575_v3  ;;  %v720_v8 = vpop.f32.mrb[70].mxu0 }
 0x1b6   :  { %v765_v13 = vadd.f32 %v1904_v30, %v740_v9  ;;  %v741_v15 = vadd.f32 %v720_v8, %v1897_v20  ;;  %1479 = vmatprep.subr.bf16.mxu1 %v1687_v0  ;;  %v1450_v16 = vpop.f32.mrb[71].mxu0  ;;  %v1579_v20 = vld [vmem:[#allocation7 + $0x38] sm:$0xff]  }
 0x1b8   :  { %v783_v18 = vmax.f32 %v765_v13, 0.0  ;;  %v766_v22 = vadd.f32 %v1904_v30, %v741_v15  ;;  %v1581_v30 = vld [vmem:[#allocation7 + $0x88] sm:$0xff]  }
 0x1b9   :  { %1480 = vmatpush3.bf16.msra.mxu1 %v1576_v11 }
 0x1ba   :  { %v1008_v21 = vmax.f32 %v1006_v4, %v783_v18  ;;  %v784_v23 = vmax.f32 %v766_v22, 0.0  ;;  %1481 = vmatprep.subr.bf16.mxu1 %v1687_v0 }
 0x1bc   :  { %v1009_v14 = vmax.f32 %v1007_v17, %v784_v23 }
 0x1bd   :  { %1482 = vmatpush3.bf16.msra.mxu1 %v1577_v19 }
 0x1be   :  { %v1010_v27 = vpack.c.bf16 %v1009_v14, %v1008_v21  ;;  %1483 = vmatprep.subr.bf16.mxu1 %v1687_v0 }
 0x1c1   :  { %1484 = vmatpush3.bf16.msra.mxu1 %v1578_v24 }
 0x1c2   :  { %1485 = vmatprep.subr.bf16.mxu1 %v1687_v0 }
 0x1c5   :  { %1486 = vmatpush3.bf16.msra.mxu1 %v1579_v20 }
 0x1c6   :  { %1491 = vmatprep.subr.bf16.mxu1 %v1687_v0 }
 0x1c8   :  { %1488 = vmatmul.mubr.bf16.vlgmr.msra.gmra.mrb[40].mxu1 %v789_v5  ;;  %v1587_v5 = vld [vmem:[#allocation7 + $0xb8] sm:$0xff]  }
 0x1c9   :  { %1492 = vmatpush3.bf16.msra.mxu1 %v1580_v25  ;;  %1507 = vmatprep.mubr.msk.bf16.mxu1 %vm1688_vm0, %v1687_v0 }
 0x1ca   :  { %1493 = vmatprep.subr.bf16.mxu1 %v1687_v0 }
 0x1cd   :  { %1494 = vmatpush3.bf16.msra.mxu1 %v1581_v30 }
 0x1ce   :  { %1495 = vmatprep.subr.bf16.mxu1 %v1687_v0 }
 0x1d1   :  { %1496 = vmatpush3.bf16.msra.mxu1 %v1582_v26 }
 0x1d2   :  { %1497 = vmatprep.subr.bf16.mxu1 %v1687_v0 }
 0x1d5   :  { %1498 = vmatpush3.bf16.msra.mxu1 %v1583_v28 }
 0x1d6   :  { %1499 = vmatprep.subr.bf16.mxu1 %v1687_v0 }
 0x1d9   :  { %1500 = vmatpush3.bf16.msra.mxu1 %v1584_v29 }
 0x1da   :  { %1501 = vmatprep.subr.bf16.mxu1 %v1687_v0 }
 0x1dd   :  { %1502 = vmatpush3.bf16.msra.mxu1 %v1585_v59 }
 0x1de   :  { %1503 = vmatprep.subr.bf16.mxu1 %v1687_v0 }
 0x1e1   :  { %1504 = vmatpush3.bf16.msra.mxu1 %v1586_v63 }
 0x1e2   :  { %1505 = vmatprep.subr.bf16.mxu1 %v1687_v0 }
 0x1e5   :  { %1506 = vmatpush3.bf16.msra.mxu1 %v1587_v5 }
 0x1e8   :  { %1508 = vmatmul.mubr.bf16.vlgmr.msra.gmra.mrb[44].mxu1 %v1010_v27 }
 0x27b   :  { %v910_v32 = vpop.f32.mrb[36].mxu1 }
 0x27c   :  { %v1469_v31 = vpop.f32.mrb[37].mxu1 }
 0x27d   :  { %v913_v33 = vpop.f32.mrb[38].mxu1 }
 0x27e   :  { %v1470_v34 = vpop.f32.mrb[39].mxu1 }
 0x29b   :  { %v999_v35 = vpop.f32.mrb[40].mxu1 }
 0x29c   :  { %v1000_v36 = vadd.f32 %v999_v35, %v910_v32  ;;  %v1489_v37 = vpop.f32.mrb[41].mxu1 }
 0x29d   :  { %v1002_v38 = vpop.f32.mrb[42].mxu1 }
 0x29e   :  { %v1003_v55 = vadd.f32 %v1002_v38, %v913_v33  ;;  %v1490_v39 = vpop.f32.mrb[43].mxu1 }
 0x2bb   :  { %v1110_v60 = vpop.f32.mrb[44].mxu1 }
 0x2bc   :  { %v1117_v41 = vadd.f32 %v1110_v60, %v1000_v36  ;;  %v1509_v43 = vpop.f32.mrb[45].mxu1 }
 0x2bd   :  { %v1113_v0 = vpop.f32.mrb[46].mxu1 }
 0x2be   :  { %v1126_v44 = vadd.f32 %v1216_v40, %v1117_v41  ;;  %v1118_v45 = vadd.f32 %v1113_v0, %v1003_v55  ;;  %v1510_v42 = vpop.f32.mrb[47].mxu1 }
 0x2c0   :  { %1128 = vst [vmem:[#allocation8] sm:$0xff] %v1126_v44  ;;  %v1127_v46 = vadd.f32 %v1216_v40, %v1118_v45 }
 0x2c2   :  { %1129 = vst [vmem:[#allocation8 + $0x8] sm:$0xff] %v1127_v46 }
 0x2c3   :  { %1665 = shalt.err (!%p1662_p0)
}
 0x2c4   :  { %s1666_s10 = scalar_lea.hbm %s1988_s5, 256 }
 0x2c5   :  { %p1667_p1 = scmp.ne.s32.totalorder %s1988_s5, %s1666_s10  ;;  %p1670_p2 = scmp.lt.u32.totalorder %s1666_s10, %s1988_s5 }
 0x2c7   :  { %p1672_p3 = pnand %p1670_p2, %p1667_p1 }
 0x2c9   :  { %1675 = shalt.err (!%p1672_p3)
}
 0x2ca   :  { %s1690_s15 = smov 128   ;;  %s1691_s16 = smov 8  }
 0x2cb   :  { %1141 = dma.vmem_to_hbm [thread:$0]  %s1136_s7, 256, %s1988_s5, [#allocation4], %s1690_s15, %s1690_s15, %s1691_s16  }
 0x2cc   :  { %1680 = dma.done.wait [#allocation4], 256  }
 0x2cd   :  { %1681 = vsyncadd [#allocation4], 4294967040 }
 0x2ce   :  { %1145 = vsyncpa [#allocation3], 1 }
 0x2cf   :  { %1146 = vsyncpa [#allocation6], 1 }
 0x2d0   :  { %1147 = vsyncpa [#allocation4], 1 }

</bundles_post_ra>
